<compile_context>
chip_gen: v7x
topology: tpu7x:2x2x1
jax: 0.10.0
libtpu: 0.0.40
codegen_flags: <defaults>
</compile_context>

<pallas_src>
import functools

import jax
import jax.numpy as jnp
from jax.experimental import pallas as pl
from jax.experimental.pallas import tpu as pltpu

_MIB = 1024 * 1024


def _tpu_budgets():
    """Generation-aware (per-tensor block bytes, vmem_limit_bytes, prefer_even_steps)."""
    vmem_bytes = 128 * _MIB
    try:
        vmem_bytes = int(pltpu.get_tpu_info().vmem_capacity_bytes)
    except Exception:
        pass
    if vmem_bytes <= 64 * _MIB:
        # v7x-class: 64 MiB per TC, 2 TCs/chip -> small blocks, restore double-buffer headroom.
        return 6 * _MIB, 48 * _MIB, True
    # v5e / v6e: 128 MiB VMEM, single TC -> larger blocks, just keep >=2 steps for overlap.
    return 20 * _MIB, 96 * _MIB, False


def _is_v5():
    try:
        return "v5" in jax.devices()[0].device_kind.lower()
    except Exception:
        return False


def _se_kernel(x_ref, w1t_ref, w2t_ref, o_ref, *, native_dtype_rescale):
    # x_ref  : (B_blk, C, HW)   block of batch elements
    # w1t_ref: (C, C_red)       fc1 weight, transposed, pre-scaled by 1/HW (f32)
    # w2t_ref: (C_red, C)       fc2 weight, transposed
    #
    # AdaptiveAvgPool2d(1): mean over the spatial axis. 1/HW is folded into w1t,
    # so a plain f32 sum suffices; the f32 upcast lives only inside this reduction
    # (no block-sized f32 temporary kept live across the kernel).
    pooled = jnp.sum(x_ref[...].astype(jnp.float32), axis=-1)            # (B_blk, C)
    # fc1 + ReLU, fc2 + Sigmoid (exp rides the EUP slot; tiny tensors).
    h = jnp.maximum(
        jnp.dot(pooled, w1t_ref[...], preferred_element_type=jnp.float32), 0.0)
    s = jax.nn.sigmoid(
        jnp.dot(h, w2t_ref[...].astype(jnp.float32),
                preferred_element_type=jnp.float32))                     # (B_blk, C)
    if native_dtype_rescale:
        # Dominant elementwise pass in the I/O dtype (bf16-native VPU on v6e/v7x;
        # identical math when the I/O dtype is f32).
        o_ref[...] = x_ref[...] * s.astype(o_ref.dtype)[:, :, None]
    else:
        # v5e bf16 path: no bf16 VPU -> keep the multiply in f32, cast at the store.
        o_ref[...] = (x_ref[...].astype(jnp.float32) * s[:, :, None]).astype(o_ref.dtype)


def _pick_batch_block(B, per_elem_bytes, budget, prefer_even_steps):
    """Largest divisor of B that fits the block budget (no batch padding)."""
    max_bblk = max(1, budget // max(1, per_elem_bytes))
    divisors = [d for d in range(1, B + 1) if B % d == 0]
    cands = [d for d in divisors if d <= max_bblk and (B < 2 or B // d >= 2)]
    if not cands:
        # TODO(synk): a single batch element exceeds the block budget (huge C*H*W);
        #             split HW across a second "arbitrary" grid axis (two-pass pool/scale).
        cands = [1]
    if prefer_even_steps:
        even = [d for d in cands if (B // d) % 2 == 0]
        if even:
            cands = even
    return max(cands)


def se_block_wrapper(x, w1, w2):
    """SEBlockWrapper(nn.Identity(), C).forward.

    x : (B, C, H, W)    activations (f32 or bf16)
    w1: (C//r, C)       Linear(C, C//r, bias=False).weight
    w2: (C, C//r)       Linear(C//r, C, bias=False).weight
    """
    B, C, H, W = x.shape
    c_red = w1.shape[0]
    HW = H * W

    budget, vmem_limit, prefer_even = _tpu_budgets()
    per_elem_bytes = C * HW * x.dtype.itemsize
    B_blk = _pick_batch_block(B, per_elem_bytes, budget, prefer_even)
    n_blocks = B // B_blk

    # Contiguous (free) reshape; no host-side padding or trailing slice of x.
    x_flat = x.reshape(B, C, HW)

    # Fold the 1/HW mean factor into fc1's weight (linear => exactly equivalent).
    w1t = w1.T.astype(jnp.float32) * (1.0 / HW)                          # (C, C_red)
    w2t = w2.T                                                           # (C_red, C)

    native_rescale = bool(x.dtype == jnp.float32) or (not _is_v5())
    kernel = functools.partial(_se_kernel, native_dtype_rescale=native_rescale)

    out_flat = pl.pallas_call(
        kernel,
        out_shape=jax.ShapeDtypeStruct((B, C, HW), x.dtype),
        grid_spec=pltpu.PrefetchScalarGridSpec(
            num_scalar_prefetch=0,
            grid=(n_blocks,),
            in_specs=[
                # Last two block dims equal the full array dims -> (8,128) rule satisfied
                # without padding; any HW tail is handled by masked stores in-kernel.
                pl.BlockSpec((B_blk, C, HW), lambda b: (b, 0, 0)),
                pl.BlockSpec((C, c_red), lambda b: (0, 0)),
                pl.BlockSpec((c_red, C), lambda b: (0, 0)),
            ],
            out_specs=pl.BlockSpec((B_blk, C, HW), lambda b: (b, 0, 0)),
        ),
        compiler_params=pltpu.CompilerParams(
            dimension_semantics=("parallel",),
            vmem_limit_bytes=vmem_limit,
        ),
    )(x_flat, w1t, w2t)

    return out_flat.reshape(B, C, H, W)


def _reference(x, w1, w2):
    # Pure-JAX reference of SEBlockWrapper(nn.Identity(), C).forward
    y = jnp.mean(x.astype(jnp.float32), axis=(2, 3))                     # (B, C)
    y = jnp.maximum(y @ w1.T.astype(jnp.float32), 0.0)                   # (B, C//r)
    y = jax.nn.sigmoid(y @ w2.T.astype(jnp.float32))                     # (B, C)
    return (x.astype(jnp.float32) * y[:, :, None, None]).astype(x.dtype)


if __name__ == "__main__":
    # Small shapes consistent with the module: channels divisible by reduction=16.
    B, C, H, W = 2, 32, 16, 16
    reduction = 16
    c_red = C // reduction

    key = jax.random.PRNGKey(0)
    kx, k1, k2 = jax.random.split(key, 3)
    x = jax.random.normal(kx, (B, C, H, W), dtype=jnp.float32)
    # Synthetic weights (shapes match nn.Linear(C, C//r) / nn.Linear(C//r, C), bias=False).
    w1 = jax.random.normal(k1, (c_red, C), dtype=jnp.float32) * 0.2
    w2 = jax.random.normal(k2, (C, c_red), dtype=jnp.float32) * 0.2

    out = se_block_wrapper(x, w1, w2)
    out = jax.block_until_ready(out)

    ref = _reference(x, w1, w2)
    assert out.shape == (B, C, H, W)
    assert jnp.allclose(out, ref, atol=1e-5, rtol=1e-5), "mismatch vs reference"

    print("KERNEL_OK")
</pallas_src>

<mosaic_0001>
module attributes {stable_mosaic.version = 11 : i64} {
  func.func @_se_kernel(%arg0: i32, %arg1: memref<1x32x256xf32, #tpu.memory_space<vmem>>, %arg2: memref<32x2xf32, #tpu.memory_space<vmem>>, %arg3: memref<2x32xf32, #tpu.memory_space<vmem>>, %arg4: memref<1x32x256xf32, #tpu.memory_space<vmem>>) attributes {dimension_semantics = [#tpu.dimension_semantics<parallel>], iteration_bounds = array<i64: 2>, scalar_prefetch = 0 : i64, scratch_operands = 0 : i64, tpu.core_type = #tpu.core_type<tc>, window_params = [{transform_indices = @transform_0, window_bounds = array<i64: 1, 32, 256>}, {pipeline_mode = #tpu.pipeline_mode<synchronous>, transform_indices = @transform_1, window_bounds = array<i64: 32, 2>}, {pipeline_mode = #tpu.pipeline_mode<synchronous>, transform_indices = @transform_2, window_bounds = array<i64: 2, 32>}, {transform_indices = @transform_3, window_bounds = array<i64: 1, 32, 256>}]} {
    %c0 = arith.constant 0 : index
    %c0_0 = arith.constant 0 : index
    %c0_1 = arith.constant 0 : index
    %0 = vector.load %arg1[%c0, %c0_0, %c0_1] : memref<1x32x256xf32, #tpu.memory_space<vmem>>, vector<1x32x256xf32>
    %cst = arith.constant dense<0.000000e+00> : vector<1x32xf32>
    %1 = vector.multi_reduction <add>, %0, %cst [2] : vector<1x32x256xf32> to vector<1x32xf32>
    %c0_2 = arith.constant 0 : index
    %c0_3 = arith.constant 0 : index
    %2 = vector.load %arg2[%c0_2, %c0_3] : memref<32x2xf32, #tpu.memory_space<vmem>>, vector<32x2xf32>
    %cst_4 = arith.constant dense<0.000000e+00> : vector<1x2xf32>
    %3 = tpu.matmul %1, %2, %cst_4 {dimension_numbers = #tpu.dot_dimension_numbers<[1], [0], [0], [1], [0, 0, 1, 1], [], []>} : vector<1x32xf32>, vector<32x2xf32>, vector<1x2xf32> -> vector<1x2xf32>
    %cst_5 = arith.constant 0.000000e+00 : f32
    %4 = vector.broadcast %cst_5 : f32 to vector<1x2xf32>
    %5 = arith.maximumf %3, %4 : vector<1x2xf32>
    %c0_6 = arith.constant 0 : index
    %c0_7 = arith.constant 0 : index
    %6 = vector.load %arg3[%c0_6, %c0_7] : memref<2x32xf32, #tpu.memory_space<vmem>>, vector<2x32xf32>
    %cst_8 = arith.constant dense<0.000000e+00> : vector<1x32xf32>
    %7 = tpu.matmul %5, %6, %cst_8 {dimension_numbers = #tpu.dot_dimension_numbers<[1], [0], [0], [1], [0, 0, 1, 1], [], []>} : vector<1x2xf32>, vector<2x32xf32>, vector<1x32xf32> -> vector<1x32xf32>
    %8 = arith.negf %7 : vector<1x32xf32>
    %9 = math.exp %8 : vector<1x32xf32>
    %cst_9 = arith.constant 1.000000e+00 : f32
    %10 = vector.broadcast %cst_9 : f32 to vector<1x32xf32>
    %11 = arith.addf %10, %9 : vector<1x32xf32>
    %12 = arith.divf %10, %11 : vector<1x32xf32>
    %c0_10 = arith.constant 0 : index
    %c0_11 = arith.constant 0 : index
    %c0_12 = arith.constant 0 : index
    %13 = vector.load %arg1[%c0_10, %c0_11, %c0_12] : memref<1x32x256xf32, #tpu.memory_space<vmem>>, vector<1x32x256xf32>
    %14 = vector.shape_cast %12 : vector<1x32xf32> to vector<1x32x1xf32>
    %15 = vector.broadcast %14 : vector<1x32x1xf32> to vector<1x32x256xf32>
    %16 = arith.mulf %13, %15 : vector<1x32x256xf32>
    %c0_13 = arith.constant 0 : index
    %c0_14 = arith.constant 0 : index
    %c0_15 = arith.constant 0 : index
    %17 = vector.load %arg4[%c0_13, %c0_14, %c0_15] : memref<1x32x256xf32, #tpu.memory_space<vmem>>, vector<1x32x256xf32>
    tpu.vector_store %arg4[%c0_13, %c0_14, %c0_15], %16 {strides = array<i32>} : memref<1x32x256xf32, #tpu.memory_space<vmem>>, vector<1x32x256xf32>,
    return
  }
  func.func @transform_0(%arg0: i32) -> (i32, i32, i32) {
    %c0_i32 = arith.constant 0 : i32
    %c0_i32_0 = arith.constant 0 : i32
    %c0_i32_1 = arith.constant 0 : i32
    return %arg0, %c0_i32, %c0_i32_0 : i32, i32, i32
  }
  func.func @transform_1(%arg0: i32) -> (i32, i32) {
    %c0_i32 = arith.constant 0 : i32
    %c0_i32_0 = arith.constant 0 : i32
    %c0_i32_1 = arith.constant 0 : i32
    return %c0_i32, %c0_i32_0 : i32, i32
  }
  func.func @transform_2(%arg0: i32) -> (i32, i32) {
    %c0_i32 = arith.constant 0 : i32
    %c0_i32_0 = arith.constant 0 : i32
    %c0_i32_1 = arith.constant 0 : i32
    return %c0_i32, %c0_i32_0 : i32, i32
  }
  func.func @transform_3(%arg0: i32) -> (i32, i32, i32) {
    %c0_i32 = arith.constant 0 : i32
    %c0_i32_0 = arith.constant 0 : i32
    %c0_i32_1 = arith.constant 0 : i32
    return %arg0, %c0_i32, %c0_i32_0 : i32, i32, i32
  }
}

</mosaic_0001>

<bundles_post_ra>
// kernel: tpu_custom_call.1
= control target key start
LH: loop header
LB: loop body
LE: loop exit
PB: predicated region body
PF: predicated region fallthrough
CT: control target
= control target key end

     0   :  { %8 = vsyncpa [#allocation3], 0  ;;  %s1165_s0 = inlined_call_operand.hbm [shape: f32[2,32,256], index: 0, kind: input, shape index: {}]   ;;  %s1166_s1 = inlined_call_operand.hbm [shape: f32[32,2], index: 1, kind: input, shape index: {}]   ;;  %s1167_s2 = inlined_call_operand.hbm [shape: f32[2,32], index: 2, kind: input, shape index: {}]   ;;  %s1168_s3 = inlined_call_operand.hbm [shape: f32[2,32,256], index: 3, kind: output, shape index: {}]  }
   0x1   :  { %10 = vsyncpa [#allocation3 + $0x1], 0 }
   0x2   :  { %11 = vsyncpa [#allocation6], 0 }
   0x3   :  { %12 = vsyncpa [#allocation4], 0 }
   0x4   :  { %14 = vsyncpa [#allocation4 + $0x1], 0  ;;  %s895_s12 = smov 0   ;;  %s897_s13 = smov 0  }
   0x5   :  { %s899_s14 = smov 0   ;;  %s901_s15 = smov 0  }
   0x6 LB: > { %s916_s16 = sadd.s32 4294967295, %s860_s15   ;;  %s571_s17 = sadd.s32 4294967294, %s860_s15   ;;  %s860_s15 = sphi %s901_s15, %s1188_s15   ;;  %s856_s14 = sphi %s899_s14, %s1187_s14   ;;  %s852_s13 = sphi %s897_s13, %s1186_s13   ;;  %s848_s12 = sphi %s895_s12, %s1185_s12  }
   0x7   : > { %p40_p0 = scmp.ne.s32.totalorder %s852_s13, %s848_s12  ;;  %p1169_p1 = scmp.eq.s32.totalorder %s916_s16, 0 }
   0x8   : > { %p112_p3 = scmp.eq.s32.totalorder %s571_s17, 1  ;;  %p572_p5 = scmp.ge.s32.totalorder %s860_s15, 1 }
   0x9   : > { %p925_p4 = por %p1169_p1, %p40_p0  ;;  %p119_p7 = scmp.lt.s32.totalorder %s860_s15, 3 }
   0xa   : > { %p930_p6 = por %p112_p3, %p40_p0  ;;  %s862_s21 = smov [#allocation5]  }
   0xb   : > { %s1172_s18 = scalar_select %p925_p4, 1, 0 }
   0xc   : > { %s1173_s19 = scalar_select %p930_p6, 1, 0 }
   0xd   : > { %p935_p8 = pnand %p572_p5, %p119_p7  ;;  %s131_s22 = sshll.u32 %s862_s21, 4  ;;  %s939_s22 = int_to_ptr.vmem [resolvable:$true] %s131_s22 }
   0xe   : > { %s863_s24 = smov [#allocation7]   ;;  %s704_s28 = scalar_lea.hbm %s1166_s1, 512 }
   0xf   : > { %p636_p9 = pneg %p935_p8  ;;  %s145_s25 = sshll.u32 %s863_s24, 4  ;;  %s950_s25 = int_to_ptr.vmem [resolvable:$true] %s145_s25 }
  0x10   : > { %p705_p12 = scmp.ne.s32.totalorder %s1166_s1, %s704_s28  ;;  %p711_p5 = scmp.lt.u32.totalorder %s704_s28, %s1166_s1 }
  0x11   : > { %p946_p11 = pnand %p636_p9, %p1169_p1 }
  0x13   : > { %p706_p13 = pneg %p946_p11 }
  0x15   : > { %p707_p0 = pnand %p706_p13, %p705_p12 }
  0x17   : > { %p708_p3 = pneg %p707_p0 }
  0x19   : > { %p713_p7 = pnand %p711_p5, %p708_p3 }
  0x1b   : > { %716 = shalt.err (!%p713_p7)
}
  0x1c   : > { %s717_s6 = scalar_lea.vmem %s939_s22, 512  ;;  %p725_p2 = scmp.lt.s32.totalorder %s939_s22, %s939_s22 }
  0x1d   : > { %p718_p9 = scmp.ne.s32.totalorder %s939_s22, %s717_s6  ;;  %p726_p12 = scmp.lt.s32.totalorder %s717_s6, %s717_s6 }
  0x1f   : > { %p720_p10 = pnand %p718_p9, %p706_p13  ;;  %p727_p0 = por %p726_p12, %p725_p2 }
  0x21   : > { %p721_p1 = pneg %p720_p10 }
  0x23   : > { %p728_p6 = pnand %p727_p0, %p721_p1 }
  0x25   : > { %731 = shalt.err (!%p728_p6)
}
  0x26   : > { %s864_s7 = smov 128   ;;  %s865_s8 = smov 8  }
  0x27   : > { %639 = dma.hbm_to_vmem [thread:$0]  (!%p946_p11), %s1166_s1, 512, %s939_s22, [#allocation6], %s864_s7, %s864_s7, %s865_s8  }
  0x28   : > { %s732_s21 = scalar_lea.hbm %s1167_s2, 32 }
  0x29   : > { %p733_p2 = scmp.ne.s32.totalorder %s1167_s2, %s732_s21  ;;  %p739_p10 = scmp.lt.u32.totalorder %s732_s21, %s1167_s2 }
  0x2b   : > { %p735_p1 = pnand %p733_p2, %p706_p13 }
  0x2d   : > { %p736_p6 = pneg %p735_p1 }
  0x2f   : > { %p741_p3 = pnand %p739_p10, %p736_p6 }
  0x31   : > { %744 = shalt.err (!%p741_p3)
}
  0x32   : > { %s745_s22 = scalar_lea.vmem %s950_s25, 32  ;;  %p753_p12 = scmp.lt.s32.totalorder %s950_s25, %s950_s25 }
  0x33   : > { %p746_p5 = scmp.ne.s32.totalorder %s950_s25, %s745_s22  ;;  %p754_p0 = scmp.lt.s32.totalorder %s745_s22, %s745_s22 }
  0x35   : > { %p748_p7 = pnand %p746_p5, %p706_p13  ;;  %p755_p2 = por %p754_p0, %p753_p12 }
  0x37   : > { %p749_p9 = pneg %p748_p7 }
  0x39   : > { %p756_p1 = pnand %p755_p2, %p749_p9 }
  0x3b   : > { %759 = shalt.err (!%p756_p1)
}
  0x3c   : > { %642 = dma.hbm_to_vmem [thread:$0]  (!%p946_p11), %s1167_s2, 32, %s950_s25, [#allocation6]  }
  0x3d   : > { %s1005_s4 = sadd.s32 1, %s860_s15   ;;  %s27_s23 = sadd.s32 1, %s856_s14 }
  0x3e   : > { %s24_s5 = ssub.s32 %s860_s15, %s1005_s4  ;;  %p34_p13 = scmp.ne.s32.totalorder %s856_s14, %s852_s13 }
  0x3f   : > { %p25_p6 = scmp.eq.s32.totalorder %s24_s5, 0  ;;  %p35_p10 = scmp.eq.s32.totalorder %s860_s15, 0 }
  0x40   : > { %p1176_p3 = scmp.eq.s32.totalorder %s916_s16, 1  ;;  %p653_p7 = scmp.lt.s32.totalorder %s860_s15, 2 }
  0x41   : > { %s1021_s7 = scalar_select %p25_p6, %s856_s14, %s27_s23  }
  0x42   : > { %p1015_p5 = por %p1176_p3, %p34_p13  ;;  %p36_p9 = por %p35_p10, %p34_p13 }
  0x43   : > { %s156_s8 = sand.u32 1, %s856_s14   ;;  %s593_s25 = sshll.u32 %s860_s15, 10 }
  0x44   : > { %s1177_s6 = scalar_select %p1015_p5, 1, 0 }
  0x45   : > { %s576_s9 = sshll.u32 %s156_s8, 6  ;;  %s1028_s17 = scalar_lea.hbm %s1165_s0, %s593_s25 }
  0x46   : > { %s160_s21 = scalar_lea.vmem [#allocation2], %s576_s9  ;;  %p1032_p11 = pnand %p653_p7, %p36_p9 }
  0x47   : > { %s167_s24 = sshll.u32 %s160_s21, 4  ;;  %s1036_s27 = scalar_lea.sflag [#allocation3], %s156_s8  ;;  %s1030_s24 = int_to_ptr.vmem [resolvable:$true] %s167_s24 }
  0x48   : > { %s760_s28 = scalar_lea.hbm %s1028_s17, 1024  ;;  %p762_p0 = pneg %p1032_p11 }
  0x49   : > { %p761_p12 = scmp.ne.s32.totalorder %s1028_s17, %s760_s28  ;;  %s765_s30 = scalar_lea.hbm %s1165_s0, 2048 }
  0x4a   : > { %p766_p13 = scmp.lt.u32.totalorder %s1028_s17, %s1165_s0  ;;  %p767_p6 = scmp.lt.u32.totalorder %s765_s30, %s760_s28 }
  0x4b   : > { %p763_p2 = pnand %p762_p0, %p761_p12  ;;  %p769_p3 = scmp.lt.u32.totalorder %s760_s28, %s1028_s17 }
  0x4c   : > { %p768_p10 = por %p767_p6, %p766_p13 }
  0x4d   : > { %p764_p1 = pneg %p763_p2 }
  0x4e   : > { %p770_p7 = por %p769_p3, %p768_p10 }
  0x50   : > { %p771_p9 = pnand %p770_p7, %p764_p1 }
  0x52   : > { %774 = shalt.err (!%p771_p9)
}
  0x53   : > { %s775_s8 = scalar_lea.vmem %s1030_s24, 1024  ;;  %s866_s9 = smov [#allocation2]  }
  0x54   : > { %p776_p12 = scmp.ne.s32.totalorder %s1030_s24, %s775_s8  ;;  %s780_s25 = sshll.u32 %s866_s9, 4  ;;  %s781_s25 = int_to_ptr.vmem [resolvable:$false] %s780_s25 }
  0x55   : > { %s782_s10 = scalar_lea.vmem %s781_s25, 2048  ;;  %p783_p4 = scmp.lt.s32.totalorder %s1030_s24, %s781_s25 }
  0x56   : > { %p778_p2 = pnand %p776_p12, %p762_p0  ;;  %p784_p13 = scmp.lt.s32.totalorder %s782_s10, %s775_s8 }
  0x58   : > { %p779_p5 = pneg %p778_p2  ;;  %p785_p6 = por %p784_p13, %p783_p4 }
  0x5a   : > { %p786_p10 = pnand %p785_p6, %p779_p5 }
  0x5c   : > { %789 = shalt.err (!%p786_p10)
}
  0x5d   : > { %s867_s11 = smov 256   ;;  %s868_s21 = smov 16  }
  0x5e   : > { %646 = dma.hbm_to_vmem [thread:$0]  (!%p1032_p11), %s1028_s17, 1024, %s1030_s24, %s1036_s27, %s867_s11, %s867_s11, %s868_s21  }
  0x5f   : > { %179 = sbr.rel (%p935_p8) target bundleno = 854 (0x356), region = 32  ;;  %s1067_s28 = sand.u32 (!%p935_p8), 1, %s852_s13  }
  0x60   : > { %s580_s22 = sshll.u32 (!%p935_p8), %s1067_s28, 6  ;;  %s182_s29 = scalar_lea.sflag (!%p935_p8), [#allocation3], %s1067_s28 }
  0x61   : > { %s185_s30 = scalar_lea.vmem (!%p935_p8), [#allocation2], %s580_s22  ;;  %p1179_p4 = scmp.ne.s32.totalorder (!%p935_p8), %s1172_s18, 0 }
  0x66   : > { %835 = dma.done.wait (%p1179_p4), %s182_s29, 1024  }
  0x67   : > { %837 = vsyncadd (%p1179_p4), %s182_s29, 4294966272  ;;  %p1180_p5 = scmp.eq.s32.totalorder %s916_s16, 0 }
  0x69   : > { %839 = dma.done.wait (%p1180_p5), [#allocation6], 544   ;;  %p1181_p8 = pmov %p1180_p5 }
  0x6a   : > { %v1081_v0 = vld [vmem:[%s185_s30] sm:$0xff]  ;;  %v1083_v1 = vld [vmem:[%s185_s30 + $0x8] sm:$0xff]  ;;  %v1091_v5 = vld [vmem:[%s185_s30 + $0x10] sm:$0xff]  ;;  %v869_v15 = vmov 0.0|0.0   ;;  %vm870_vm0 = vmmov 0   ;;  %v871_v19 = vmov 0.0   ;;  %v244_v20 = vlaneseq }
  0x6b   : > { %841 = vsyncadd (%p1181_p8), [#allocation6], 4294966752  ;;  %v1085_v2 = vld [vmem:[%s185_s30 + $0x20] sm:$0xff]  ;;  %v224_v3 = vadd.f32 %v1083_v1, %v1081_v0  ;;  %v1089_v4 = vld [vmem:[%s185_s30 + $0x28] sm:$0xff]  ;;  %618 = vmatprep.subr.bf16.mxu0 %v869_v15  ;;  %610 = vmatprep.mubr.msk.f32.mxu0 %vm870_vm0, %v871_v19  ;;  %vm255_vm1 = vcmask 130112   ;;  %vm262_vm2 = vcmask 195712  }
  0x6c   : > { %v1093_v6 = vld [vmem:[%s185_s30 + $0x18] sm:$0xff]  ;;  %v230_v7 = vadd.f32 %v1089_v4, %v1085_v2  ;;  %v1097_v8 = vld [vmem:[%s185_s30 + $0x30] sm:$0xff]  ;;  %v236_v12 = vld [vmem:[#allocation5] sm:$0xff]  ;;  %613 = vmatprep.subr.mxu1 %v871_v19  ;;  %615 = vmatprep.mubr.msk.f32.mxu1 %vm870_vm0, %v871_v19  ;;  %v245_v21 = vand.u32 127, %v244_v20  ;;  %v247_v22 = vshrl.u32 %v244_v20, 7  ;;  %vm269_vm3 = vcmask 261312  }
  0x6d   : > { %v1099_v9 = vld [vmem:[%s185_s30 + $0x38] sm:$0xff]  ;;  %225 = vadd.xlane.f32.xlu0 %v224_v3  ;;  %v227_v10 = vadd.f32 %v1093_v6, %v1091_v5  ;;  %v237_v13 = vld [vmem:[#allocation5 + $0x8] sm:$0xff]  ;;  %v238_v16 = vld [vmem:[#allocation5 + $0x10] sm:$0xff]  ;;  %vm271_vm4 = vcmask 261120   ;;  %vm350_vm5 = vcmask 1041408   ;;  %vm346_vm6 = vcmask 15360  }
  0x6e   : > { %231 = vadd.xlane.f32.xlu1 %v230_v7  ;;  %v233_v11 = vadd.f32 %v1099_v9, %v1097_v8  ;;  %v619_v14 = vpack.c.bf16 %v237_v13, %v236_v12  ;;  %v239_v17 = vld [vmem:[#allocation5 + $0x18] sm:$0xff]  ;;  %v250_v23 = vadd.s32 4294967288, %v245_v21  ;;  %v257_v24 = vadd.s32 4294967280, %v245_v21  ;;  %v345_v41 = vld [vmem:[#allocation7] sm:$0x3]  ;;  %s215_s18 = scalar_lea.vmem [#allocation8], %s580_s22 }
  0x6f   : > { %v622_v18 = vpack.c.bf16 %v239_v17, %v238_v16  ;;  %v264_v25 = vadd.s32 4294967272, %v245_v21  ;;  %v248_v27 = vsub.s32 %v245_v21, %v247_v22  ;;  %614 = vmatpush3.msk.msra.mxu1 %vm350_vm5, %v345_v41  ;;  %v432_v50 = vsub.s32 0, %v247_v22  ;;  %s479_s20 = sshll.u32 %s215_s18, 4  ;;  %s594_s17 = sshll.u32 %s916_s16, 10  ;;  %s1114_s20 = int_to_ptr.vmem [resolvable:$true] %s479_s20 }
  0x70   : > { %620 = vmatpush3.bf16.msra.mxu0 %v619_v14  ;;  %v253_v29 = vsub.s32 %v250_v23, %v247_v22  ;;  %v260_v30 = vsub.s32 %v257_v24, %v247_v22  ;;  %s1119_s27 = scalar_lea.hbm %s1168_s3, %s594_s17  ;;  %s466_s16 = scalar_lea.sflag [#allocation4], %s1067_s28 }
  0x71   : > { %228 = vadd.xlane.f32.xlu0 %v227_v10  ;;  %621 = vmatprep.subr.bf16.mxu0 %v869_v15  ;;  %v267_v31 = vsub.s32 %v264_v25, %v247_v22  ;;  %s790_s23 = scalar_lea.vmem %s1114_s20, 1024  ;;  %p1182_p0 = scmp.ne.s32.totalorder %s1177_s6, 0 }
  0x72   : > { %234 = vadd.xlane.f32.xlu1 %v233_v11  ;;  %p791_p11 = scmp.ne.s32.totalorder %s1114_s20, %s790_s23  ;;  %s872_s5 = smov [#allocation8]  }
  0x73   : > { %s794_s8 = sshll.u32 %s872_s5, 4  ;;  %s795_s8 = int_to_ptr.vmem [resolvable:$false] %s794_s8 }
  0x74   : > { %623 = vmatpush3.bf16.msra.mxu0 %v622_v18  ;;  %p792_p1 = pnand %p791_p11, %p1182_p0  ;;  %s796_s9 = scalar_lea.vmem %s795_s8, 2048 }
  0x75   : > { %p797_p7 = scmp.lt.s32.totalorder %s1114_s20, %s795_s8  ;;  %p798_p9 = scmp.lt.s32.totalorder %s796_s9, %s790_s23 }
  0x76   : > { %p793_p3 = pneg %p792_p1 }
  0x77   : > { %p799_p12 = por %p798_p9, %p797_p7 }
  0x79   : > { %p800_p2 = pnand %p799_p12, %p793_p3 }
  0xfa   : > { %v226_v26 = vpop.xlane.xlu0 %225 }
  0xfb   : > { %v232_v28 = vpop.xlane.xlu1 %231  ;;  %v249_v33 = vrot.slane %v226_v26, %v248_v27 }
  0xfc   : > { %v261_v36 = vrot.slane %v232_v28, %v260_v30 }
  0xfe   : > { %v229_v32 = vpop.xlane.xlu0 %228 }
  0xff   : > { %v254_v34 = vrot.slane %v229_v32, %v253_v29  ;;  %v235_v35 = vpop.xlane.xlu1 %234 }
 0x100   : > { %v268_v37 = vrot.slane %v235_v35, %v267_v31 }
 0x101   : > { %v256_v38 = vsel %vm255_vm1, %v254_v34, %v249_v33 }
 0x102   : > { %v263_v39 = vsel %vm262_vm2, %v261_v36, %v256_v38 }
 0x103   : > { %v270_v40 = vsel %vm269_vm3, %v268_v37, %v263_v39 }
 0x104   : > { %611 = vmatmul.mubr.msk.f32.vlgmr.msra.gmra.mrb[0].mxu0 %vm271_vm4, %v270_v40 }
 0x1d7   : > { %v340_v42 = vpop.f32.mrb[0].mxu0 }
 0x1d8   : > { %v344_v43 = vmax.f32 %v340_v42, 0.0  ;;  %v612_v44 = vpop.f32.mrb[1].mxu0 }
 0x1da   : > { %616 = vmatmul.mubr.msk.f32.vlgmr.msra.gmra.mrb[0].mxu1 %vm346_vm6, %v344_v43 }
 0x2ad   : > { %v420_v45 = vpop.f32.mrb[0].mxu1 }
 0x2ae   : > { %v587_v46 = vmul.f32 -1.442695, %v420_v45  ;;  %v617_v47 = vpop.f32.mrb[1].mxu1 }
 0x2b0   : > { %700 = vpow2.f32 %v587_v46 }
 0x2ba   : > { %v701_v48 = vpop.eup %700 }
 0x2bb   : > { %v427_v49 = vadd.f32 1.0, %v701_v48 }
 0x2bd   : > { %702 = vrcp.f32 %v427_v49 }
 0x2c7   : > { %v703_v51 = vpop.eup %702 }
 0x2c8   : > { %v433_v52 = vrot.slane %v703_v51, %v432_v50 }
 0x2ca   : > { %439 = vbcast.lane.b32.xlu1 %v433_v52, 264  ;;  %435 = vbcast.lane.b32.xlu0 %v433_v52, 256 }
 0x2ce   : > { %443 = vbcast.lane.b32.xlu1 %v433_v52, 272 }
 0x2d2   : > { %447 = vbcast.lane.b32.xlu1 %v433_v52, 280 }
 0x33c   : > { %v440_v53 = vpop.permute.xlu1 %439  ;;  %v436_v54 = vpop.permute.xlu0 %435 }
 0x33d   : > { %v451_v55 = vmul.f32 %v440_v53, %v1091_v5  ;;  %v452_v56 = vmul.f32 %v440_v53, %v1093_v6  ;;  %v449_v57 = vmul.f32 %v436_v54, %v1081_v0  ;;  %v450_v58 = vmul.f32 %v436_v54, %v1083_v1 }
 0x33f   : > { %459 = vst [vmem:[%s215_s18 + $0x10] sm:$0xff] %v451_v55  ;;  %460 = vst [vmem:[%s215_s18 + $0x18] sm:$0xff] %v452_v56 }
 0x340   : > { %457 = vst [vmem:[%s215_s18] sm:$0xff] %v449_v57  ;;  %458 = vst [vmem:[%s215_s18 + $0x8] sm:$0xff] %v450_v58  ;;  %v444_v59 = vpop.permute.xlu1 %443 }
 0x341   : > { %v453_v60 = vmul.f32 %v444_v59, %v1085_v2  ;;  %v454_v61 = vmul.f32 %v444_v59, %v1089_v4 }
 0x343   : > { %461 = vst [vmem:[%s215_s18 + $0x20] sm:$0xff] %v453_v60  ;;  %462 = vst [vmem:[%s215_s18 + $0x28] sm:$0xff] %v454_v61 }
 0x344   : > { %v448_v62 = vpop.permute.xlu1 %447 }
 0x345   : > { %v455_v63 = vmul.f32 %v448_v62, %v1097_v8  ;;  %v456_v0 = vmul.f32 %v448_v62, %v1099_v9 }
 0x347   : > { %463 = vst [vmem:[%s215_s18 + $0x30] sm:$0xff] %v455_v63  ;;  %464 = vst [vmem:[%s215_s18 + $0x38] sm:$0xff] %v456_v0 }
 0x348   : > { %803 = shalt.err (!%p800_p2)
}
 0x349   : > { %s804_s25 = scalar_lea.hbm %s1119_s27, 1024  ;;  %s808_s21 = scalar_lea.hbm %s1168_s3, 2048 }
 0x34a   : > { %p805_p13 = scmp.ne.s32.totalorder %s1119_s27, %s804_s25  ;;  %p809_p4 = scmp.lt.u32.totalorder %s1119_s27, %s1168_s3 }
 0x34b   : > { %p810_p5 = scmp.lt.u32.totalorder %s808_s21, %s804_s25  ;;  %p812_p11 = scmp.lt.u32.totalorder %s804_s25, %s1119_s27 }
 0x34c   : > { %p806_p6 = pnand %p805_p13, %p1182_p0 }
 0x34d   : > { %p811_p8 = por %p810_p5, %p809_p4 }
 0x34e   : > { %p807_p10 = pneg %p806_p6 }
 0x34f   : > { %p813_p1 = por %p812_p11, %p811_p8 }
 0x351   : > { %p814_p3 = pnand %p813_p1, %p807_p10 }
 0x353   : > { %817 = shalt.err (!%p814_p3)
}
 0x354   : > { %s873_s30 = smov 256   ;;  %s874_s18 = smov 16  }
 0x355   : > { %634 = dma.vmem_to_hbm [thread:$0]  (%p1182_p0), %s1114_s20, 1024, %s1119_s27, %s466_s16, %s873_s30, %s873_s30, %s874_s18  }
 0x356 PF: > { %s494_s17 = sand.u32 1, %s848_s12   ;;  %p1183_p7 = scmp.ne.s32.totalorder %s1173_s19, 0 }
 0x357   : > { %p1184_p9 = scmp.ge.s32.totalorder %s860_s15, 2  ;;  %s495_s24 = scalar_lea.sflag [#allocation4], %s494_s17 }
 0x359   : > { %p648_p12 = pnand %p1184_p9, %p1183_p7 }
 0x35b   : > { %843 = dma.done.wait (!%p648_p12), %s495_s24, 1024  }
 0x35c   : > { %845 = vsyncadd (!%p648_p12), %s495_s24, 4294966272  ;;  %p17_p2 = scmp.ge.s32.totalorder %s1005_s4, 4   ;;  %s1185_s12 = smov %s852_s13 }
 0x35d   : > { %s1186_s13 = smov %s856_s14  ;;  %s1187_s14 = smov %s1021_s7 }
 0x35e   : > { %s1188_s15 = smov %s1005_s4  ;;  %19 = sbr.rel (!%p17_p2) target bundleno = 6 (0x6), region = 85 }
 0x365   :  { %500 = vsyncpa [#allocation3], 1 }
 0x366   :  { %502 = vsyncpa [#allocation3 + $0x1], 1 }
 0x367   :  { %503 = vsyncpa [#allocation6], 1 }
 0x368   :  { %504 = vsyncpa [#allocation4], 1 }
 0x369   :  { %506 = vsyncpa [#allocation4 + $0x1], 1 }

</bundles_post_ra>
